<compile_context>
chip_gen: v5e
topology: v5e:2x2
jax: 0.10.0
libtpu: 0.0.40
codegen_flags: <defaults>
</compile_context>

<pallas_src>
import math
import numpy as np
import jax
import jax.numpy as jnp
from jax.experimental import pallas as pl
from jax.experimental.pallas import tpu as pltpu

LATENT = 3
NUM_CLASSES = 10
IMG_FLAT = 28 * 28          # 784
EMB = 16
HID = 128
HEAD_OUT = 128              # fused mu|logvar head width (lanes 0:3 mu, 3:6 logvar)


def _round_up(n, m):
    return (n + m - 1) // m * m


# ------------------------------------------------------------------ kernel ---
def cvae_kernel(
    # streamed per-batch-tile inputs
    x_ref, lab_ref, eps_ref,
    # encoder params (VMEM-resident, constant index_map)
    we_h_img_ref, table_e_ref, be_h_ref,
    w_head_ref, b_head_ref,
    # decoder params
    wd_h_z_ref, table_d_ref, bd_h_ref,
    wd_out_ref, bd_out_ref,
    # outputs
    recon_ref, mulv_ref,
):
    f32 = jnp.float32
    wdt = we_h_img_ref.dtype                      # bf16 matmul operand dtype
    bt = x_ref.shape[0]

    # One-hot built in-kernel from int32 labels (drops the [B,10] HBM stream).
    lab = lab_ref[...]                                            # [bt, 1] int32
    oh = (jax.lax.broadcasted_iota(jnp.int32, (bt, NUM_CLASSES), 1) == lab)
    oh = oh.astype(wdt)                                           # exact 0/1

    x = x_ref[...]                                                # [bt, 784] bf16

    # ---------------- Encoder ----------------
    # hidden = relu(x @ W_img + one_hot @ table_e + b)   (f32 accumulation)
    h = jnp.dot(x, we_h_img_ref[...], preferred_element_type=f32)
    h = h + jnp.dot(oh, table_e_ref[...], preferred_element_type=f32)
    h = jnp.maximum(h + be_h_ref[...], 0.0)                       # [bt, 128] f32

    # Fused lane-dense mu|logvar head: lanes [0:3) mu, [3:6) logvar, rest zero.
    mulv = jnp.dot(h.astype(wdt), w_head_ref[...],
                   preferred_element_type=f32) + b_head_ref[...]   # [bt, 128] f32
    mulv_ref[...] = mulv

    mu = mulv[:, :LATENT]                                          # [bt, 3]
    logvar = mulv[:, LATENT:2 * LATENT]                            # [bt, 3]

    # ---------------- Reparameterize (f32 elementwise) ----------------
    z = mu + eps_ref[...] * jnp.exp(0.5 * logvar)                  # [bt, 3]

    # ---------------- Decoder ----------------
    hd = jnp.dot(z.astype(wdt), wd_h_z_ref[...], preferred_element_type=f32)
    hd = hd + jnp.dot(oh, table_d_ref[...], preferred_element_type=f32)
    hd = jnp.maximum(hd + bd_h_ref[...], 0.0)                      # [bt, 128] f32

    logits = jnp.dot(hd.astype(wdt), wd_out_ref[...],
                     preferred_element_type=f32) + bd_out_ref[...]  # [bt, 784] f32

    # sigmoid(x) == 0.5 * (tanh(x/2) + 1): single EUP push per element.
    recon = 0.5 * (jnp.tanh(0.5 * logits) + 1.0)
    recon_ref[...] = recon.astype(recon_ref.dtype)


# ------------------------------------------------------------ param helpers ---
def _linear_init(key, in_f, out_f):
    """PyTorch-style uniform(-1/sqrt(in), 1/sqrt(in)) init. Returns (W[in,out], b[1,out])."""
    kw, kb = jax.random.split(key)
    bound = 1.0 / math.sqrt(in_f)
    w = jax.random.uniform(kw, (in_f, out_f), jnp.float32, -bound, bound)
    b = jax.random.uniform(kb, (1, out_f), jnp.float32, -bound, bound)
    return w, b


def init_cvae_params(key):
    keys = jax.random.split(key, 7)
    # Encoder
    we_lab, be_lab = _linear_init(keys[0], NUM_CLASSES, EMB)
    we_h, be_h = _linear_init(keys[1], IMG_FLAT + EMB, HID)
    we_mu, be_mu = _linear_init(keys[2], HID, LATENT)
    we_lv, be_lv = _linear_init(keys[3], HID, LATENT)
    # Decoder
    wd_lab, bd_lab = _linear_init(keys[4], NUM_CLASSES, EMB)
    wd_h, bd_h = _linear_init(keys[5], LATENT + EMB, HID)
    wd_out, bd_out = _linear_init(keys[6], HID, IMG_FLAT)
    return dict(
        we_lab=we_lab, be_lab=be_lab,
        we_h_img=we_h[:IMG_FLAT], we_h_lab=we_h[IMG_FLAT:], be_h=be_h,
        we_mu=we_mu, be_mu=be_mu,
        we_lv=we_lv, be_lv=be_lv,
        wd_lab=wd_lab, bd_lab=bd_lab,
        wd_h_z=wd_h[:LATENT], wd_h_lab=wd_h[LATENT:], bd_h=bd_h,
        wd_out=wd_out, bd_out=bd_out,
    )


def pack_params(p, dtype=jnp.bfloat16):
    """One-time packing of PyTorch-layout params into kernel-friendly layout.

    NOTE: the folded tables are exact only for one-hot rows with exactly one hot
    entry; out-of-range labels would silently diverge from the PyTorch path.
    """
    # Fold label-embedding branches (exact: one_hot selects a single row):
    #   relu(oh @ W_lab + b_lab) @ W_h_lab == oh @ (relu(W_lab + b_lab) @ W_h_lab)
    table_e = jax.nn.relu(p["we_lab"] + p["be_lab"]) @ p["we_h_lab"]   # [10, 128]
    table_d = jax.nn.relu(p["wd_lab"] + p["bd_lab"]) @ p["wd_h_lab"]   # [10, 128]

    # Fused 128-lane mu|logvar head: lanes [0:3) = mu, [3:6) = logvar, rest zero.
    pad = HEAD_OUT - 2 * LATENT
    w_head = jnp.concatenate(
        [p["we_mu"], p["we_lv"], jnp.zeros((HID, pad), jnp.float32)], axis=1)
    b_head = jnp.concatenate(
        [p["be_mu"], p["be_lv"], jnp.zeros((1, pad), jnp.float32)], axis=1)

    return dict(
        # matmul weights in bf16 (f32 accumulation inside the kernel)
        we_h_img=p["we_h_img"].astype(dtype),     # [784, 128]
        table_e=table_e.astype(dtype),            # [10, 128]
        w_head=w_head.astype(dtype),              # [128, 128]
        wd_h_z=p["wd_h_z"].astype(dtype),         # [3, 128]
        table_d=table_d.astype(dtype),            # [10, 128]
        wd_out=p["wd_out"].astype(dtype),         # [128, 784]
        # biases stay f32 (added to f32 accumulators)
        be_h=p["be_h"], b_head=b_head, bd_h=p["bd_h"], bd_out=p["bd_out"],
    )


# ---------------------------------------------------------------- forward ---
def cvae_forward(x, y, kparams, eps, block_b=512):
    """x: [B, 1, 28, 28] float (NCHW), y: [B] int, eps: [B, LATENT] f32.

    Returns (recon [B,1,28,28] bf16, mu [B,3] f32, logvar [B,3] f32).
    """
    B = x.shape[0]

    # Streamed tensors: bf16 image (halves HBM read traffic), int32 labels, f32 eps.
    x_bf = x.reshape(B, IMG_FLAT).astype(jnp.bfloat16)
    lab = y.astype(jnp.int32).reshape(B, 1)
    eps = eps.astype(jnp.float32)

    # Batch tiling: no batch padding; ragged last tile is handled by Pallas.
    if B <= 16:
        bt = B                               # single tile (bt == full batch dim)
    else:
        # multiple-of-8 tile; >= 2 grid steps so ("parallel",) can use both v7x
        # TensorCores; block_b=512 keeps the footprint inside v5e's 16 MiB VMEM.
        bt = min(_round_up(block_b, 8), _round_up((B + 1) // 2, 8))
    grid = (pl.cdiv(B, bt),)

    def bspec(cols):
        return pl.BlockSpec((bt, cols), lambda i: (i, 0))

    def wspec(shape):  # VMEM-resident weights: constant index_map, never re-fetched
        return pl.BlockSpec(shape, lambda i: (0, 0))

    in_specs = [
        bspec(IMG_FLAT),                     # x        [bt, 784] bf16
        bspec(1),                            # labels   [bt, 1]   int32
        bspec(LATENT),                       # eps      [bt, 3]   f32
        wspec((IMG_FLAT, HID)),              # we_h_img
        wspec((NUM_CLASSES, HID)),           # table_e
        wspec((1, HID)),                     # be_h
        wspec((HID, HEAD_OUT)),              # w_head
        wspec((1, HEAD_OUT)),                # b_head
        wspec((LATENT, HID)),                # wd_h_z
        wspec((NUM_CLASSES, HID)),           # table_d
        wspec((1, HID)),                     # bd_h
        wspec((HID, IMG_FLAT)),              # wd_out
        wspec((1, IMG_FLAT)),                # bd_out
    ]
    out_specs = (bspec(IMG_FLAT), bspec(HEAD_OUT))
    out_shape = (
        jax.ShapeDtypeStruct((B, IMG_FLAT), jnp.bfloat16),   # recon (bf16 store)
        jax.ShapeDtypeStruct((B, HEAD_OUT), jnp.float32),    # fused mu|logvar
    )

    recon_flat, mulv = pl.pallas_call(
        cvae_kernel,
        grid=grid,
        in_specs=in_specs,
        out_specs=out_specs,
        out_shape=out_shape,
        compiler_params=pltpu.CompilerParams(
            dimension_semantics=("parallel",)),
    )(x_bf, lab, eps,
      kparams["we_h_img"], kparams["table_e"], kparams["be_h"],
      kparams["w_head"], kparams["b_head"],
      kparams["wd_h_z"], kparams["table_d"], kparams["bd_h"],
      kparams["wd_out"], kparams["bd_out"])

    recon = recon_flat.reshape(B, 1, 28, 28)
    mu = mulv[:, :LATENT]
    logvar = mulv[:, LATENT:2 * LATENT]
    return recon, mu, logvar


# -------------------------------------------------------------- reference ---
def cvae_reference(x, y, params, eps):
    """Pure-JAX f32 reference of the original (unfolded) forward pass."""
    B = x.shape[0]
    x_flat = x.reshape(B, IMG_FLAT).astype(jnp.float32)
    oh = jax.nn.one_hot(y, NUM_CLASSES, dtype=jnp.float32)
    emb_e = jax.nn.relu(oh @ params["we_lab"] + params["be_lab"])
    h = jax.nn.relu(x_flat @ params["we_h_img"] + emb_e @ params["we_h_lab"] + params["be_h"])
    mu = h @ params["we_mu"] + params["be_mu"]
    logvar = h @ params["we_lv"] + params["be_lv"]
    z = mu + eps * jnp.exp(0.5 * logvar)
    emb_d = jax.nn.relu(oh @ params["wd_lab"] + params["bd_lab"])
    hd = jax.nn.relu(z @ params["wd_h_z"] + emb_d @ params["wd_h_lab"] + params["bd_h"])
    recon = jax.nn.sigmoid(hd @ params["wd_out"] + params["bd_out"])
    return recon.reshape(B, 1, 28, 28), mu, logvar


if __name__ == "__main__":
    key = jax.random.PRNGKey(0)
    k_params, k_x, k_y, k_eps = jax.random.split(key, 4)

    B = 2
    x = jax.random.uniform(k_x, (B, 1, 28, 28), jnp.float32)        # image in [0,1)
    y = jax.random.randint(k_y, (B,), 0, NUM_CLASSES, jnp.int32)    # class labels
    eps = jax.random.normal(k_eps, (B, LATENT), jnp.float32)        # reparam noise

    params = init_cvae_params(k_params)
    kparams = pack_params(params)                                   # bf16 weights

    recon, mu, logvar = cvae_forward(x, y, kparams, eps)
    jax.block_until_ready((recon, mu, logvar))

    ref_recon, ref_mu, ref_logvar = cvae_reference(x, y, params, eps)
    assert recon.shape == (B, 1, 28, 28)
    # bf16 matmul operands / bf16 recon store vs. f32 reference -> loosened tolerance.
    np.testing.assert_allclose(np.asarray(recon, dtype=np.float32),
                               np.asarray(ref_recon), rtol=3e-2, atol=3e-2)
    np.testing.assert_allclose(np.asarray(mu), np.asarray(ref_mu), rtol=3e-2, atol=3e-2)
    np.testing.assert_allclose(np.asarray(logvar), np.asarray(ref_logvar), rtol=3e-2, atol=3e-2)

    print("KERNEL_OK")
</pallas_src>

<mosaic_0001>
module attributes {stable_mosaic.version = 11 : i64} {
  func.func @cvae_kernel(%arg0: i32, %arg1: memref<2x784xbf16, #tpu.memory_space<vmem>>, %arg2: memref<2x1xi32, #tpu.memory_space<vmem>>, %arg3: memref<2x3xf32, #tpu.memory_space<vmem>>, %arg4: memref<784x128xbf16, #tpu.memory_space<vmem>>, %arg5: memref<10x128xbf16, #tpu.memory_space<vmem>>, %arg6: memref<1x128xf32, #tpu.memory_space<vmem>>, %arg7: memref<128x128xbf16, #tpu.memory_space<vmem>>, %arg8: memref<1x128xf32, #tpu.memory_space<vmem>>, %arg9: memref<3x128xbf16, #tpu.memory_space<vmem>>, %arg10: memref<10x128xbf16, #tpu.memory_space<vmem>>, %arg11: memref<1x128xf32, #tpu.memory_space<vmem>>, %arg12: memref<128x784xbf16, #tpu.memory_space<vmem>>, %arg13: memref<1x784xf32, #tpu.memory_space<vmem>>, %arg14: memref<2x784xbf16, #tpu.memory_space<vmem>>, %arg15: memref<2x128xf32, #tpu.memory_space<vmem>>) attributes {dimension_semantics = [#tpu.dimension_semantics<parallel>], iteration_bounds = array<i64: 1>, scalar_prefetch = 0 : i64, scratch_operands = 0 : i64, tpu.core_type = #tpu.core_type<tc>, window_params = [{transform_indices = @transform_0, window_bounds = array<i64: 2, 784>}, {transform_indices = @transform_1, window_bounds = array<i64: 2, 1>}, {transform_indices = @transform_2, window_bounds = array<i64: 2, 3>}, {pipeline_mode = #tpu.pipeline_mode<synchronous>, transform_indices = @transform_3, window_bounds = array<i64: 784, 128>}, {pipeline_mode = #tpu.pipeline_mode<synchronous>, transform_indices = @transform_4, window_bounds = array<i64: 10, 128>}, {pipeline_mode = #tpu.pipeline_mode<synchronous>, transform_indices = @transform_5, window_bounds = array<i64: 1, 128>}, {pipeline_mode = #tpu.pipeline_mode<synchronous>, transform_indices = @transform_6, window_bounds = array<i64: 128, 128>}, {pipeline_mode = #tpu.pipeline_mode<synchronous>, transform_indices = @transform_7, window_bounds = array<i64: 1, 128>}, {pipeline_mode = #tpu.pipeline_mode<synchronous>, transform_indices = @transform_8, window_bounds = array<i64: 3, 128>}, {pipeline_mode = #tpu.pipeline_mode<synchronous>, transform_indices = @transform_9, window_bounds = array<i64: 10, 128>}, {pipeline_mode = #tpu.pipeline_mode<synchronous>, transform_indices = @transform_10, window_bounds = array<i64: 1, 128>}, {pipeline_mode = #tpu.pipeline_mode<synchronous>, transform_indices = @transform_11, window_bounds = array<i64: 128, 784>}, {pipeline_mode = #tpu.pipeline_mode<synchronous>, transform_indices = @transform_12, window_bounds = array<i64: 1, 784>}, {transform_indices = @transform_13, window_bounds = array<i64: 2, 784>}, {transform_indices = @transform_14, window_bounds = array<i64: 2, 128>}]} {
    %c0 = arith.constant 0 : index
    %c0_0 = arith.constant 0 : index
    %0 = vector.load %arg2[%c0, %c0_0] : memref<2x1xi32, #tpu.memory_space<vmem>>, vector<2x1xi32>
    %1 = tpu.iota {dimensions = array<i32: 1>} : vector<2x10xi32>
    %2 = vector.broadcast %0 : vector<2x1xi32> to vector<2x10xi32>
    %3 = arith.cmpi eq, %1, %2 : vector<2x10xi32>
    %4 = arith.extui %3 : vector<2x10xi1> to vector<2x10xi32>
    %5 = arith.sitofp %4 : vector<2x10xi32> to vector<2x10xf32>
    %6 = arith.truncf %5 : vector<2x10xf32> to vector<2x10xbf16>
    %c0_1 = arith.constant 0 : index
    %c0_2 = arith.constant 0 : index
    %7 = vector.load %arg1[%c0_1, %c0_2] : memref<2x784xbf16, #tpu.memory_space<vmem>>, vector<2x784xbf16>
    %c0_3 = arith.constant 0 : index
    %c0_4 = arith.constant 0 : index
    %8 = vector.load %arg4[%c0_3, %c0_4] : memref<784x128xbf16, #tpu.memory_space<vmem>>, vector<784x128xbf16>
    %cst = arith.constant dense<0.000000e+00> : vector<2x128xf32>
    %9 = tpu.matmul %7, %8, %cst {dimension_numbers = #tpu.dot_dimension_numbers<[1], [0], [0], [1], [0, 0, 1, 1], [], []>} : vector<2x784xbf16>, vector<784x128xbf16>, vector<2x128xf32> -> vector<2x128xf32>
    %c0_5 = arith.constant 0 : index
    %c0_6 = arith.constant 0 : index
    %10 = vector.load %arg5[%c0_5, %c0_6] : memref<10x128xbf16, #tpu.memory_space<vmem>>, vector<10x128xbf16>
    %cst_7 = arith.constant dense<0.000000e+00> : vector<2x128xf32>
    %11 = tpu.matmul %6, %10, %cst_7 {dimension_numbers = #tpu.dot_dimension_numbers<[1], [0], [0], [1], [0, 0, 1, 1], [], []>} : vector<2x10xbf16>, vector<10x128xbf16>, vector<2x128xf32> -> vector<2x128xf32>
    %12 = arith.addf %9, %11 : vector<2x128xf32>
    %c0_8 = arith.constant 0 : index
    %c0_9 = arith.constant 0 : index
    %13 = vector.load %arg6[%c0_8, %c0_9] : memref<1x128xf32, #tpu.memory_space<vmem>>, vector<1x128xf32>
    %14 = vector.broadcast %13 : vector<1x128xf32> to vector<2x128xf32>
    %15 = arith.addf %12, %14 : vector<2x128xf32>
    %cst_10 = arith.constant 0.000000e+00 : f32
    %16 = vector.broadcast %cst_10 : f32 to vector<2x128xf32>
    %17 = arith.maximumf %15, %16 : vector<2x128xf32>
    %18 = arith.truncf %17 : vector<2x128xf32> to vector<2x128xbf16>
    %c0_11 = arith.constant 0 : index
    %c0_12 = arith.constant 0 : index
    %19 = vector.load %arg7[%c0_11, %c0_12] : memref<128x128xbf16, #tpu.memory_space<vmem>>, vector<128x128xbf16>
    %cst_13 = arith.constant dense<0.000000e+00> : vector<2x128xf32>
    %20 = tpu.matmul %18, %19, %cst_13 {dimension_numbers = #tpu.dot_dimension_numbers<[1], [0], [0], [1], [0, 0, 1, 1], [], []>} : vector<2x128xbf16>, vector<128x128xbf16>, vector<2x128xf32> -> vector<2x128xf32>
    %c0_14 = arith.constant 0 : index
    %c0_15 = arith.constant 0 : index
    %21 = vector.load %arg8[%c0_14, %c0_15] : memref<1x128xf32, #tpu.memory_space<vmem>>, vector<1x128xf32>
    %22 = vector.broadcast %21 : vector<1x128xf32> to vector<2x128xf32>
    %23 = arith.addf %20, %22 : vector<2x128xf32>
    %c0_16 = arith.constant 0 : index
    %c0_17 = arith.constant 0 : index
    %24 = vector.load %arg15[%c0_16, %c0_17] : memref<2x128xf32, #tpu.memory_space<vmem>>, vector<2x128xf32>
    tpu.vector_store %arg15[%c0_16, %c0_17], %23 {strides = array<i32>} : memref<2x128xf32, #tpu.memory_space<vmem>>, vector<2x128xf32>,
    %25 = vector.extract_strided_slice %23 {offsets = [0, 0], sizes = [2, 3], strides = [1, 1]} : vector<2x128xf32> to vector<2x3xf32>
    %26 = vector.extract_strided_slice %23 {offsets = [0, 3], sizes = [2, 3], strides = [1, 1]} : vector<2x128xf32> to vector<2x3xf32>
    %c0_18 = arith.constant 0 : index
    %c0_19 = arith.constant 0 : index
    %27 = vector.load %arg3[%c0_18, %c0_19] : memref<2x3xf32, #tpu.memory_space<vmem>>, vector<2x3xf32>
    %cst_20 = arith.constant 5.000000e-01 : f32
    %28 = vector.broadcast %cst_20 : f32 to vector<2x3xf32>
    %29 = arith.mulf %28, %26 : vector<2x3xf32>
    %30 = math.exp %29 : vector<2x3xf32>
    %31 = arith.mulf %27, %30 : vector<2x3xf32>
    %32 = arith.addf %25, %31 : vector<2x3xf32>
    %33 = arith.truncf %32 : vector<2x3xf32> to vector<2x3xbf16>
    %c0_21 = arith.constant 0 : index
    %c0_22 = arith.constant 0 : index
    %34 = vector.load %arg9[%c0_21, %c0_22] : memref<3x128xbf16, #tpu.memory_space<vmem>>, vector<3x128xbf16>
    %cst_23 = arith.constant dense<0.000000e+00> : vector<2x128xf32>
    %35 = tpu.matmul %33, %34, %cst_23 {dimension_numbers = #tpu.dot_dimension_numbers<[1], [0], [0], [1], [0, 0, 1, 1], [], []>} : vector<2x3xbf16>, vector<3x128xbf16>, vector<2x128xf32> -> vector<2x128xf32>
    %c0_24 = arith.constant 0 : index
    %c0_25 = arith.constant 0 : index
    %36 = vector.load %arg10[%c0_24, %c0_25] : memref<10x128xbf16, #tpu.memory_space<vmem>>, vector<10x128xbf16>
    %cst_26 = arith.constant dense<0.000000e+00> : vector<2x128xf32>
    %37 = tpu.matmul %6, %36, %cst_26 {dimension_numbers = #tpu.dot_dimension_numbers<[1], [0], [0], [1], [0, 0, 1, 1], [], []>} : vector<2x10xbf16>, vector<10x128xbf16>, vector<2x128xf32> -> vector<2x128xf32>
    %38 = arith.addf %35, %37 : vector<2x128xf32>
    %c0_27 = arith.constant 0 : index
    %c0_28 = arith.constant 0 : index
    %39 = vector.load %arg11[%c0_27, %c0_28] : memref<1x128xf32, #tpu.memory_space<vmem>>, vector<1x128xf32>
    %40 = vector.broadcast %39 : vector<1x128xf32> to vector<2x128xf32>
    %41 = arith.addf %38, %40 : vector<2x128xf32>
    %cst_29 = arith.constant 0.000000e+00 : f32
    %42 = vector.broadcast %cst_29 : f32 to vector<2x128xf32>
    %43 = arith.maximumf %41, %42 : vector<2x128xf32>
    %44 = arith.truncf %43 : vector<2x128xf32> to vector<2x128xbf16>
    %c0_30 = arith.constant 0 : index
    %c0_31 = arith.constant 0 : index
    %45 = vector.load %arg12[%c0_30, %c0_31] : memref<128x784xbf16, #tpu.memory_space<vmem>>, vector<128x784xbf16>
    %cst_32 = arith.constant dense<0.000000e+00> : vector<2x784xf32>
    %46 = tpu.matmul %44, %45, %cst_32 {dimension_numbers = #tpu.dot_dimension_numbers<[1], [0], [0], [1], [0, 0, 1, 1], [], []>} : vector<2x128xbf16>, vector<128x784xbf16>, vector<2x784xf32> -> vector<2x784xf32>
    %c0_33 = arith.constant 0 : index
    %c0_34 = arith.constant 0 : index
    %47 = vector.load %arg13[%c0_33, %c0_34] : memref<1x784xf32, #tpu.memory_space<vmem>>, vector<1x784xf32>
    %48 = vector.broadcast %47 : vector<1x784xf32> to vector<2x784xf32>
    %49 = arith.addf %46, %48 : vector<2x784xf32>
    %cst_35 = arith.constant 5.000000e-01 : f32
    %50 = vector.broadcast %cst_35 : f32 to vector<2x784xf32>
    %51 = arith.mulf %50, %49 : vector<2x784xf32>
    %52 = math.tanh %51 : vector<2x784xf32>
    %cst_36 = arith.constant 1.000000e+00 : f32
    %53 = vector.broadcast %cst_36 : f32 to vector<2x784xf32>
    %54 = arith.addf %52, %53 : vector<2x784xf32>
    %cst_37 = arith.constant 5.000000e-01 : f32
    %55 = vector.broadcast %cst_37 : f32 to vector<2x784xf32>
    %56 = arith.mulf %55, %54 : vector<2x784xf32>
    %57 = arith.truncf %56 : vector<2x784xf32> to vector<2x784xbf16>
    %c0_38 = arith.constant 0 : index
    %c0_39 = arith.constant 0 : index
    %58 = vector.load %arg14[%c0_38, %c0_39] : memref<2x784xbf16, #tpu.memory_space<vmem>>, vector<2x784xbf16>
    tpu.vector_store %arg14[%c0_38, %c0_39], %57 {strides = array<i32>} : memref<2x784xbf16, #tpu.memory_space<vmem>>, vector<2x784xbf16>,
    return
  }
  func.func @transform_0(%arg0: i32) -> (i32, i32) {
    %c0_i32 = arith.constant 0 : i32
    %c0_i32_0 = arith.constant 0 : i32
    return %arg0, %c0_i32 : i32, i32
  }
  func.func @transform_1(%arg0: i32) -> (i32, i32) {
    %c0_i32 = arith.constant 0 : i32
    %c0_i32_0 = arith.constant 0 : i32
    return %arg0, %c0_i32 : i32, i32
  }
  func.func @transform_2(%arg0: i32) -> (i32, i32) {
    %c0_i32 = arith.constant 0 : i32
    %c0_i32_0 = arith.constant 0 : i32
    return %arg0, %c0_i32 : i32, i32
  }
  func.func @transform_3(%arg0: i32) -> (i32, i32) {
    %c0_i32 = arith.constant 0 : i32
    %c0_i32_0 = arith.constant 0 : i32
    %c0_i32_1 = arith.constant 0 : i32
    return %c0_i32, %c0_i32_0 : i32, i32
  }
  func.func @transform_4(%arg0: i32) -> (i32, i32) {
    %c0_i32 = arith.constant 0 : i32
    %c0_i32_0 = arith.constant 0 : i32
    %c0_i32_1 = arith.constant 0 : i32
    return %c0_i32, %c0_i32_0 : i32, i32
  }
  func.func @transform_5(%arg0: i32) -> (i32, i32) {
    %c0_i32 = arith.constant 0 : i32
    %c0_i32_0 = arith.constant 0 : i32
    %c0_i32_1 = arith.constant 0 : i32
    return %c0_i32, %c0_i32_0 : i32, i32
  }
  func.func @transform_6(%arg0: i32) -> (i32, i32) {
    %c0_i32 = arith.constant 0 : i32
    %c0_i32_0 = arith.constant 0 : i32
    %c0_i32_1 = arith.constant 0 : i32
    return %c0_i32, %c0_i32_0 : i32, i32
  }
  func.func @transform_7(%arg0: i32) -> (i32, i32) {
    %c0_i32 = arith.constant 0 : i32
    %c0_i32_0 = arith.constant 0 : i32
    %c0_i32_1 = arith.constant 0 : i32
    return %c0_i32, %c0_i32_0 : i32, i32
  }
  func.func @transform_8(%arg0: i32) -> (i32, i32) {
    %c0_i32 = arith.constant 0 : i32
    %c0_i32_0 = arith.constant 0 : i32
    %c0_i32_1 = arith.constant 0 : i32
    return %c0_i32, %c0_i32_0 : i32, i32
  }
  func.func @transform_9(%arg0: i32) -> (i32, i32) {
    %c0_i32 = arith.constant 0 : i32
    %c0_i32_0 = arith.constant 0 : i32
    %c0_i32_1 = arith.constant 0 : i32
    return %c0_i32, %c0_i32_0 : i32, i32
  }
  func.func @transform_10(%arg0: i32) -> (i32, i32) {
    %c0_i32 = arith.constant 0 : i32
    %c0_i32_0 = arith.constant 0 : i32
    %c0_i32_1 = arith.constant 0 : i32
    return %c0_i32, %c0_i32_0 : i32, i32
  }
  func.func @transform_11(%arg0: i32) -> (i32, i32) {
    %c0_i32 = arith.constant 0 : i32
    %c0_i32_0 = arith.constant 0 : i32
    %c0_i32_1 = arith.constant 0 : i32
    return %c0_i32, %c0_i32_0 : i32, i32
  }
  func.func @transform_12(%arg0: i32) -> (i32, i32) {
    %c0_i32 = arith.constant 0 : i32
    %c0_i32_0 = arith.constant 0 : i32
    %c0_i32_1 = arith.constant 0 : i32
    return %c0_i32, %c0_i32_0 : i32, i32
  }
  func.func @transform_13(%arg0: i32) -> (i32, i32) {
    %c0_i32 = arith.constant 0 : i32
    %c0_i32_0 = arith.constant 0 : i32
    return %arg0, %c0_i32 : i32, i32
  }
  func.func @transform_14(%arg0: i32) -> (i32, i32) {
    %c0_i32 = arith.constant 0 : i32
    %c0_i32_0 = arith.constant 0 : i32
    return %arg0, %c0_i32 : i32, i32
  }
}

</mosaic_0001>

<bundles_post_ra>
// kernel: tpu_custom_call.1
= control target key start
LH: loop header
LB: loop body
LE: loop exit
PB: predicated region body
PF: predicated region fallthrough
CT: control target
= control target key end

     0   :  { %20 = vsyncpa [#allocation3], 0  ;;  %v1968_v2 = vmov 0   ;;  %vm169_vm0 = vcmask 1044480   ;;  %s2617_s0 = inlined_call_operand.vmem [shape: bf16[2,784], index: 0, kind: input, shape index: {}]   ;;  %s2618_s1 = inlined_call_operand.vmem [shape: s32[2,1], index: 1, kind: input, shape index: {}]   ;;  %s2619_s2 = inlined_call_operand.vmem [shape: f32[2,3], index: 2, kind: input, shape index: {}]   ;;  %s2620_s3 = inlined_call_operand.vmem [shape: bf16[784,128], index: 3, kind: input, shape index: {}]   ;;  %s2621_s4 = inlined_call_operand.vmem [shape: bf16[10,128], index: 4, kind: input, shape index: {}]   ;;  %s2622_s5 = inlined_call_operand.vmem [shape: f32[1,128], index: 5, kind: input, shape index: {}]   ;;  %s2623_s6 = inlined_call_operand.vmem [shape: bf16[128,128], index: 6, kind: input, shape index: {}]   ;;  %s2624_s7 = inlined_call_operand.vmem [shape: f32[1,128], index: 7, kind: input, shape index: {}]   ;;  %s2625_s8 = inlined_call_operand.vmem [shape: bf16[3,128], index: 8, kind: input, shape index: {}]   ;;  %s2626_s9 = inlined_call_operand.vmem [shape: bf16[10,128], index: 9, kind: input, shape index: {}]   ;;  %s2627_s10 = inlined_call_operand.vmem [shape: f32[1,128], index: 10, kind: input, shape index: {}]   ;;  %s2628_s11 = inlined_call_operand.vmem [shape: bf16[128,784], index: 11, kind: input, shape index: {}]   ;;  %s2629_s12 = inlined_call_operand.vmem [shape: f32[1,784], index: 12, kind: input, shape index: {}]   ;;  %s2630_s13 = inlined_call_operand.hbm [shape: bf16[2,784], index: 13, kind: output, shape index: {0}]   ;;  %s2631_s14 = inlined_call_operand.hbm [shape: f32[2,128], index: 14, kind: output, shape index: {1}]  }
   0x1   :  { %v49_v0 = vld [vmem:[%s2618_s1] sm:$0x3]  ;;  %v1798_v1 = vld [vmem:[%s2620_s3 + $0xb8] sm:$0xff]  ;;  %1896 = vset.pattern.permute.xlu0 %v1968_v2  ;;  %v1797_v3 = vld [vmem:[%s2620_s3 + $0xb0] sm:$0xff] }
   0x2   :  { %53 = vperm.xlu0 %1896, %v49_v0   ;;  %524 = vmatpush.bf16.msra.mxu3 %v1798_v1  ;;  %v1790_v4 = vld [vmem:[%s2620_s3 + $0x78] sm:$0xff]  ;;  %v1789_v5 = vld [vmem:[%s2620_s3 + $0x70] sm:$0xff]  ;;  %v59_v6 = vld [vmem:[%s2617_s0] sm:$0x7f] }
   0x3   :  { %511 = vmatpush.bf16.msra.mxu2 %v1790_v4  ;;  %v1313_v7 = vld [vmem:[%s2621_s4] sm:$0xf]  ;;  %v1824_v8 = vld [vmem:[%s2621_s4] sm:$0x10]  ;;  %187 = vst [vmem:[#allocation1] ss:$9 sm:$0xff] %v59_v6 }
   0x4   :  { %v1314_v9 = vor.u32 %v1824_v8, %v1313_v7  ;;  %v1796_v10 = vld [vmem:[%s2620_s3 + $0xa8] sm:$0xff]  ;;  %v1782_v11 = vld [vmem:[%s2620_s3 + $0x38] sm:$0xff]  ;;  %v1781_v14 = vld [vmem:[%s2620_s3 + $0x30] sm:$0xff] }
   0x5   :  { %v1788_v13 = vld [vmem:[%s2620_s3 + $0x68] sm:$0xff]  ;;  %v1795_v15 = vld [vmem:[%s2620_s3 + $0xa0] sm:$0xff] }
   0x6   :  { %525 = vmatpush.bf16.msra.mxu3 %v1797_v3  ;;  %v171_v12 = vsel %vm169_vm0, %v1314_v9, 0 }
   0x7   :  { %512 = vmatpush.bf16.msra.mxu2 %v1789_v5  ;;  %180 = vmatpush.bf16.msra.mxu1 %v171_v12 }
   0xa   :  { %526 = vmatpush.bf16.msra.mxu3 %v1796_v10 }
   0xb   :  { %498 = vmatpush.bf16.msrb.mxu1 %v1782_v11 }
   0xc   :  { %21 = vsyncpa [#allocation5], 0  ;;  %513 = vmatpush.bf16.msra.mxu2 %v1788_v13  ;;  %v1787_v16 = vld [vmem:[%s2620_s3 + $0x60] sm:$0xff]  ;;  %v1780_v17 = vld [vmem:[%s2620_s3 + $0x28] sm:$0xff]  ;;  %vm495_vm1 = vcmask 130048   ;;  %v50_v56 = vlaneseq  ;;  %v1969_v60 = vmov 0.0  }
   0xd   :  { %v1794_v18 = vld [vmem:[%s2620_s3 + $0x98] sm:$0xff]  ;;  %v1779_v20 = vld [vmem:[%s2620_s3 + $0x20] sm:$0xff]  ;;  %v1793_v21 = vld [vmem:[%s2620_s3 + $0x90] sm:$0xff]  ;;  %vm165_vm3 = vcmask 80896   ;;  %vm717_vm4 = vcmask 1040384   ;;  %vm718_vm5 = vcmask 1041408  }
   0xe   :  { %527 = vmatpush.bf16.msra.mxu3 %v1795_v15  ;;  %v1786_v19 = vld [vmem:[%s2620_s3 + $0x58] sm:$0xff]  ;;  %v1785_v23 = vld [vmem:[%s2620_s3 + $0x50] sm:$0xff]  ;;  %v1792_v26 = vld [vmem:[%s2620_s3 + $0x88] sm:$0xff]  ;;  %v51_v58 = vand.u32 127, %v50_v56  ;;  %vm713_vm6 = vcmask 23552   ;;  %vm1267_vm7 = vcmask 1041409  }
   0xf   :  { %499 = vmatpush.bf16.msrb.mxu1 %v1781_v14  ;;  %v1806_v22 = vld [vmem:[%s2620_s3 + $0xf8] sm:$0xff]  ;;  %v1805_v24 = vld [vmem:[%s2620_s3 + $0xf0] sm:$0xff]  ;;  %v1547_v27 = vld [vmem:[%s2626_s9] sm:$0xf]  ;;  %vm1249_vm9 = vcmask 1042434   ;;  %vm1270_vm11 = vcmask 1043459  }
  0x10   :  { %514 = vmatpush.bf16.msra.mxu2 %v1787_v16  ;;  %537 = vmatpush.bf16.msra.mxu0 %v1806_v22  ;;  %v1778_v25 = vld [vmem:[%s2620_s3 + $0x18] sm:$0xff]  ;;  %v1833_v28 = vld [vmem:[%s2626_s9] sm:$0x10]  ;;  %v1784_v29 = vld [vmem:[%s2620_s3 + $0x48] sm:$0xff]  ;;  %vm1254_vm12 = vcmask 1044484   ;;  %vm1273_vm15 = vcmask 1045509  }
  0x11   :  { %v1777_v30 = vld [vmem:[%s2620_s3 + $0x10] sm:$0xff]  ;;  %v1791_v31 = vld [vmem:[%s2620_s3 + $0x80] sm:$0xff]  ;;  %v1548_v32 = vor.u32 %v1833_v28, %v1547_v27  ;;  %v1822_v35 = vld [vmem:[%s2620_s3 + $0x178] sm:$0xff]  ;;  %s1285_s27 = sshll.u32 %s2630_s13, 4  ;;  %s1286_s27 = int_to_ptr.hbm [resolvable:$true] %s1285_s27 }
  0x12   :  { %528 = vmatpush.bf16.msra.mxu3 %v1794_v18  ;;  %v1823_v33 = vld [vmem:[%s2620_s3 + $0x180] sm:$0xff]  ;;  %v190_v36 = vld [vmem:[#allocation1 + $0x12] sm:$0xff]  ;;  %v1776_v40 = vld [vmem:[%s2620_s3 + $0x8] sm:$0xff] }
  0x13   :  { %500 = vmatpush.bf16.msrb.mxu1 %v1780_v17  ;;  %v1783_v34 = vld [vmem:[%s2620_s3 + $0x40] sm:$0xff]  ;;  %v698_v37 = vsel %vm169_vm0, %v1548_v32, 0  ;;  %v1821_v38 = vld [vmem:[%s2620_s3 + $0x170] sm:$0xff]  ;;  %v1820_v41 = vld [vmem:[%s2620_s3 + $0x168] sm:$0xff]  ;;  %vm1258_vm0 = vcmask 1046534  }
  0x14   :  { %515 = vmatpush.bf16.msra.mxu2 %v1786_v19  ;;  %538 = vmatpush.bf16.msra.mxu0 %v1805_v24  ;;  %v194_v39 = vld [vmem:[#allocation1 + $0x36] sm:$0xff]  ;;  %v1804_v42 = vld [vmem:[%s2620_s3 + $0xe8] sm:$0xff]  ;;  %v1775_v43 = vld [vmem:[%s2620_s3] sm:$0xff] }
  0x15   :  { %v1819_v44 = vld [vmem:[%s2620_s3 + $0x160] sm:$0xff]  ;;  %v189_v46 = vld [vmem:[#allocation1 + $0x9] sm:$0xff]  ;;  %v1818_v47 = vld [vmem:[%s2620_s3 + $0x158] sm:$0xff] }
  0x16   :  { %529 = vmatpush.bf16.msra.mxu3 %v1793_v21  ;;  %v1803_v45 = vld [vmem:[%s2620_s3 + $0xe0] sm:$0xff]  ;;  %v1802_v48 = vld [vmem:[%s2620_s3 + $0xd8] sm:$0xff]  ;;  %v1817_v49 = vld [vmem:[%s2620_s3 + $0x150] sm:$0xff] }
  0x17   :  { %501 = vmatpush.bf16.msrb.mxu1 %v1779_v20  ;;  %v1801_v50 = vld [vmem:[%s2620_s3 + $0xd0] sm:$0xff]  ;;  %v1816_v51 = vld [vmem:[%s2620_s3 + $0x148] sm:$0xff]  ;;  %v1815_v53 = vld [vmem:[%s2620_s3 + $0x140] sm:$0xff] }
  0x18   :  { %516 = vmatpush.bf16.msra.mxu2 %v1785_v23  ;;  %539 = vmatpush.bf16.msra.mxu0 %v1804_v42  ;;  %v1800_v52 = vld [vmem:[%s2620_s3 + $0xc8] sm:$0xff]  ;;  %v1799_v54 = vld [vmem:[%s2620_s3 + $0xc0] sm:$0xff]  ;;  %v1814_v62 = vld [vmem:[%s2620_s3 + $0x138] sm:$0xff] }
  0x19   :  { %v193_v55 = vld [vmem:[#allocation1 + $0x2d] sm:$0xff]  ;;  %v191_v57 = vld [vmem:[#allocation1 + $0x1b] sm:$0xff]  ;;  %v192_v8 = vld [vmem:[#allocation1 + $0x24] sm:$0xff] }
  0x1a   :  { %530 = vmatpush.bf16.msra.mxu3 %v1792_v26  ;;  %v1813_v0 = vld [vmem:[%s2620_s3 + $0x130] sm:$0xff]  ;;  %v1812_v1 = vld [vmem:[%s2620_s3 + $0x128] sm:$0xff]  ;;  %v1811_v2 = vld [vmem:[%s2620_s3 + $0x120] sm:$0xff] }
  0x1b   :  { %502 = vmatpush.bf16.msrb.mxu1 %v1778_v25  ;;  %v188_v3 = vld [vmem:[#allocation1] sm:$0xff]  ;;  %v1810_v4 = vld [vmem:[%s2620_s3 + $0x118] sm:$0xff]  ;;  %v1809_v5 = vld [vmem:[%s2620_s3 + $0x110] sm:$0xff] }
  0x1c   :  { %517 = vmatpush.bf16.msra.mxu2 %v1784_v29  ;;  %540 = vmatpush.bf16.msra.mxu0 %v1803_v45  ;;  %v1808_v6 = vld [vmem:[%s2620_s3 + $0x108] sm:$0xff]  ;;  %v1807_v7 = vld [vmem:[%s2620_s3 + $0x100] sm:$0xff]  ;;  %v1832_v14 = vld [vmem:[%s2623_s6 + $0x38] sm:$0xff] }
  0x1d   :  { %v1831_v16 = vld [vmem:[%s2623_s6 + $0x30] sm:$0xff]  ;;  %v1830_v17 = vld [vmem:[%s2623_s6 + $0x28] sm:$0xff]  ;;  %v1829_v19 = vld [vmem:[%s2623_s6 + $0x20] sm:$0xff] }
  0x1e   :  { %531 = vmatpush.bf16.msra.mxu3 %v1791_v31  ;;  %v1828_v21 = vld [vmem:[%s2623_s6 + $0x18] sm:$0xff]  ;;  %v1827_v24 = vld [vmem:[%s2623_s6 + $0x10] sm:$0xff]  ;;  %v1826_v26 = vld [vmem:[%s2623_s6 + $0x8] sm:$0xff] }
  0x1f   :  { %503 = vmatpush.bf16.msrb.mxu1 %v1777_v30  ;;  %v1825_v29 = vld [vmem:[%s2623_s6] sm:$0xff]  ;;  %vm1268_vm8 = vmor %vm1267_vm7, %vm717_vm4 }
  0x20   :  { %518 = vmatpush.bf16.msra.mxu2 %v1783_v34  ;;  %541 = vmatpush.bf16.msra.mxu0 %v1802_v48  ;;  %vm1269_vm10 = vmor %vm1249_vm9, %vm1268_vm8 }
  0x21   :  { %532 = vmatmul.bf16.vlgmr.msra.gmra.mxu3 %v190_v36  ;;  %vm1271_vm13 = vmor %vm1270_vm11, %vm1269_vm10 }
  0x22   :  { %583 = vmatpush.bf16.msrb.mxu3 %v1823_v33  ;;  %vm1272_vm14 = vmor %vm1254_vm12, %vm1271_vm13 }
  0x23   :  { %504 = vmatpush.bf16.msrb.mxu1 %v1776_v40  ;;  %519 = vmatmul.bf16.vlgmr.msra.gmra.mxu2 %v189_v46  ;;  %v1897_v40 = vld [vmem:[%s2622_s5] ss:$0 sm:$0xff] }
  0x24   :  { %563 = vmatpush.bf16.msrb.mxu2 %v1822_v35  ;;  %542 = vmatpush.bf16.msra.mxu0 %v1801_v50  ;;  %v689_v46 = vld [vmem:[%s2625_s8] sm:$0x3]  ;;  %s1971_s8 = smov 125  }
  0x26   :  { %707 = vmatpush.bf16.msra.mxu3 %v698_v37 }
  0x27   :  { %505 = vmatpush.bf16.msrb.mxu1 %v1775_v43 }
  0x28   :  { %564 = vmatpush.bf16.msrb.mxu2 %v1821_v38  ;;  %543 = vmatpush.bf16.msra.mxu0 %v1800_v52 }
  0x2c   :  { %565 = vmatpush.bf16.msrb.mxu2 %v1820_v41  ;;  %544 = vmatpush.bf16.msra.mxu0 %v1799_v54 }
  0x2f   :  { %545 = vmatmul.bf16.vlgmr.msra.gmra.mxu0 %v191_v57 }
  0x30   :  { %566 = vmatpush.bf16.msrb.mxu2 %v1819_v44  ;;  %664 = vmatpush.bf16.msrb.mxu0 %v1832_v14  ;;  %v1869_v14 = vld [vmem:[%s2628_s11 + $0x11c] sm:$0xf] }
  0x31   :  { %1512 = vmatmul.msk.bf16.vlgmr.msrb.gmra.mxu3 %vm495_vm1, %v194_v39  ;;  %vm1274_vm1 = vmor %vm1273_vm15, %vm1272_vm14 }
  0x34   :  { %567 = vmatpush.bf16.msrb.mxu2 %v1818_v47  ;;  %665 = vmatpush.bf16.msrb.mxu0 %v1831_v16  ;;  %v1970_v47 = vmov 65535   ;;  %v1701_v16 = vld [vmem:[%s2628_s11 + $0x120] sm:$0xf] }
  0x35   :  { %v719_v48 = vsel %vm717_vm4, 4294967295, %v1970_v47  ;;  %v1851_v47 = vld [vmem:[%s2628_s11 + $0x88] sm:$0xf0] }
  0x38   :  { %568 = vmatpush.bf16.msrb.mxu2 %v1817_v49  ;;  %666 = vmatpush.bf16.msrb.mxu0 %v1830_v17  ;;  %v720_v49 = vsel %vm718_vm5, %v719_v48, 0  ;;  %v1873_v17 = vld [vmem:[%s2628_s11 + $0x138] sm:$0xf0] }
  0x39   :  { %v722_v50 = vand.u32 %v720_v49, %v689_v46  ;;  %v1609_v46 = vld [vmem:[%s2628_s11 + $0x70] sm:$0xf] }
  0x3c   :  { %569 = vmatpush.bf16.msrb.mxu2 %v1816_v51  ;;  %667 = vmatpush.bf16.msrb.mxu0 %v1829_v19  ;;  %v1898_v51 = vld [vmem:[%s2624_s7] ss:$0 sm:$0xff] }
  0x3d   :  { %v1665_v19 = vld [vmem:[%s2628_s11 + $0xe0] sm:$0xf] }
  0x40   :  { %570 = vmatpush.bf16.msrb.mxu2 %v1815_v53  ;;  %668 = vmatpush.bf16.msrb.mxu0 %v1828_v21 }
  0x43   :  { %571 = vmatmul.bf16.vlgmr.msrb.gmra.mxu2 %v193_v55 }
  0x44   :  { %669 = vmatpush.bf16.msrb.mxu0 %v1827_v24  ;;  %v1884_v24 = vld [vmem:[%s2628_s11 + $0x194] sm:$0xf] }
  0x48   :  { %670 = vmatpush.bf16.msrb.mxu0 %v1826_v26  ;;  %v1667_v26 = vld [vmem:[%s2628_s11 + $0xfc] sm:$0xf0] }
  0x4c   :  { %671 = vmatpush.bf16.msrb.mxu0 %v1825_v29  ;;  %v1866_v29 = vld [vmem:[%s2628_s11 + $0x100] sm:$0xf0] }
  0x74   :  { %v54_v59 = vpop.permute.xlu0 %53 }
  0x75   :  { %vm55_vm2 = vcmp.eq.s32.totalorder %v51_v58, %v54_v59  ;;  %v1749_v58 = vld [vmem:[%s2628_s11 + $0x188] sm:$0xf]  ;;  %v1886_v59 = vld [vmem:[%s2628_s11 + $0x1a0] sm:$0xf0] }
  0x76   :  { %v1310_v61 = vsel %vm55_vm2, 1.0, %v1969_v60  ;;  %v1883_v60 = vld [vmem:[%s2628_s11 + $0x18c] sm:$0xf]  ;;  %vm1275_vm2 = vcmask 129030  }
  0x77   :  { %v58_v63 = vpack.c.bf16 %v1310_v61, %v1310_v61  ;;  %v1750_v61 = vor.u32 %v1886_v59, %v1749_v58  ;;  %v1610_v58 = vor.u32 %v1851_v47, %v1609_v46  ;;  %v1581_v59 = vld [vmem:[%s2628_s11 + $0x38] sm:$0xf]  ;;  %v1591_v46 = vld [vmem:[%s2628_s11 + $0x5c] sm:$0xf0]  ;;  %v1709_v47 = vld [vmem:[%s2628_s11 + $0x128] sm:$0xf] }
  0x78   :  { %vm1276_vm7 = vmor %vm1275_vm2, %vm1274_vm1 }
  0x79   :  { %1315 = vmatmul.msk.bf16.vlgmr.msra.gmra.mxu1 %vm165_vm3, %v58_v63  ;;  %1549 = vmatmul.msk.bf16.vlgmr.msra.gmra.mxu3 %vm165_vm3, %v58_v63  ;;  %v1757_v63 = vld [vmem:[%s2628_s11 + $0x190] sm:$0xf]  ;;  %vm1262_vm3 = vcmask 1045508  }
  0x7a   :  { %550 = vmatpush.bf16.msra.mxu1 %v1814_v62  ;;  %v1751_v62 = vld [vmem:[%s2628_s11 + $0x1a4] sm:$0xf0]  ;;  %1112 = vmatpush.bf16.msra.mxu2 %v1750_v61 }
  0x7e   :  { %551 = vmatpush.bf16.msra.mxu1 %v1813_v0  ;;  %v1887_v0 = vld [vmem:[%s2628_s11 + $0x1a8] sm:$0xf0] }
  0x82   :  { %552 = vmatpush.bf16.msra.mxu1 %v1812_v1  ;;  %v1754_v1 = vor.u32 %v1883_v60, %v1751_v62  ;;  %v1844_v60 = vld [vmem:[%s2628_s11 + $0x50] sm:$0xf0] }
  0x84   :  { %1125 = vmatpush.bf16.msrb.mxu3 %v1754_v1  ;;  %v1856_v1 = vld [vmem:[%s2628_s11 + $0xb4] sm:$0xf] }
  0x86   :  { %553 = vmatpush.bf16.msra.mxu1 %v1811_v2  ;;  %v1758_v2 = vor.u32 %v1887_v0, %v1757_v63  ;;  %v1841_v0 = vld [vmem:[%s2628_s11 + $0x3c] sm:$0xf] }
  0x88   :  { %1138 = vmatpush.bf16.msra.mxu0 %v1758_v2  ;;  %v1647_v2 = vld [vmem:[%s2628_s11 + $0xcc] sm:$0xf0] }
  0x89   :  { %506 = vmatmul.bf16.vlgmr.msrb.gmra.mxu1 %v188_v3  ;;  %v1721_v3 = vld [vmem:[%s2628_s11 + $0x150] sm:$0xf] }
  0x8a   :  { %554 = vmatpush.bf16.msra.mxu1 %v1810_v4  ;;  %v1879_v4 = vld [vmem:[%s2628_s11 + $0x168] sm:$0xf0] }
  0x8e   :  { %555 = vmatpush.bf16.msra.mxu1 %v1809_v5  ;;  %v1876_v5 = vld [vmem:[%s2628_s11 + $0x154] sm:$0xf] }
  0x92   :  { %556 = vmatpush.bf16.msra.mxu1 %v1808_v6  ;;  %v1722_v6 = vor.u32 %v1879_v4, %v1721_v3  ;;  %v1583_v3 = vld [vmem:[%s2628_s11 + $0x54] sm:$0xf0]  ;;  %v1589_v4 = vld [vmem:[%s2628_s11 + $0x40] sm:$0xf] }
  0x94   :  { %1113 = vmatpush.bf16.msra.mxu2 %v1722_v6  ;;  %v678_v6 = vld [vmem:[%s2619_s2] sm:$0x3] }
  0x96   :  { %557 = vmatpush.bf16.msra.mxu1 %v1807_v7  ;;  %v1723_v7 = vld [vmem:[%s2628_s11 + $0x16c] sm:$0xf0] }
  0x99   :  { %558 = vmatmul.bf16.vlgmr.msra.gmra.mxu1 %v192_v8  ;;  %v1729_v8 = vld [vmem:[%s2628_s11 + $0x158] sm:$0xf] }
  0x9a   :  { %731 = vmatpush.bf16.msrb.mxu1 %v722_v50 }
  0xa4   :  { %v533_v9 = vpop.f32.mrf.mxu3 }
  0xa6   :  { %v520_v13 = vpop.f32.mrf.mxu2 }
  0xac   :  { %v535_v10 = vpop.f32.mrf.mxu3  ;;  %v546_v18 = vpop.f32.mrf.mxu0 }
  0xad   :  { %v1726_v10 = vor.u32 %v1876_v5, %v1723_v7  ;;  %v1845_v5 = vld [vmem:[%s2628_s11 + $0x58] sm:$0xf0]  ;;  %v1582_v7 = vor.u32 %v1844_v60, %v1581_v59  ;;  %v1563_v59 = vld [vmem:[%s2628_s11 + $0x24] sm:$0xf0]  ;;  %v1681_v60 = vld [vmem:[%s2628_s11 + $0xf0] sm:$0xf] }
  0xae   :  { %v522_v15 = vpop.f32.mrf.mxu2 }
  0xaf   :  { %v1695_v15 = vld [vmem:[%s2628_s11 + $0x134] sm:$0xf0]  ;;  %1126 = vmatpush.bf16.msrb.mxu3 %v1726_v10  ;;  %v1650_v10 = vor.u32 %v1856_v1, %v1647_v2 }
  0xb0   :  { %v1698_v21 = vor.u32 %v1869_v14, %v1695_v15  ;;  %v1849_v14 = vld [vmem:[%s2628_s11 + $0x7c] sm:$0xf]  ;;  %v1619_v15 = vld [vmem:[%s2628_s11 + $0x94] sm:$0xf0] }
  0xb3   :  { %1127 = vmatpush.bf16.msrb.mxu3 %v1698_v21  ;;  %v1765_v21 = vld [vmem:[%s2628_s11 + $0x198] sm:$0xf] }
  0xb4   :  { %v585_v11 = vpop.f32.mrf.mxu3  ;;  %v548_v22 = vpop.f32.mrf.mxu0 }
  0xb5   :  { %v1702_v22 = vor.u32 %v1873_v17, %v1701_v16  ;;  %v1555_v17 = vld [vmem:[%s2628_s11 + $0x1c] sm:$0xf0] }
  0xbc   :  { %v587_v12 = vpop.f32.mrf.mxu3 }
  0xbd   :  { %v1693_v12 = vld [vmem:[%s2628_s11 + $0x118] sm:$0xf] }
  0xc6   :  { %v572_v20 = vpop.f32.mrf.mxu2 }
  0xce   :  { %v574_v25 = vpop.f32.mrf.mxu2 }
  0xcf   :  { %v1759_v25 = vld [vmem:[%s2628_s11 + $0x1ac] sm:$0xf0] }
  0xf6   :  { %v182_v23 = vpop.f32.mrf.mxu1 }
  0xfc   :  { %v2237_v27 = vpop.f32.mrf.mxu3 }
  0xfe   :  { %v184_v28 = vpop.f32.mrf.mxu1 }
  0xff   :  { %v1673_v28 = vld [vmem:[%s2628_s11 + $0xe8] sm:$0xf] }
 0x104   :  { %v711_v30 = vpop.f32.mrf.mxu3 }
 0x105   :  { %v1762_v30 = vor.u32 %v1884_v24, %v1759_v25  ;;  %v1767_v25 = vld [vmem:[%s2628_s11 + $0x1b4] sm:$0xf0] }
 0x106   :  { %v507_v31 = vpop.f32.mrf.mxu1 }
 0x107   :  { %v508_v32 = vadd.f32 %v507_v31, %v182_v23  ;;  %v1862_v23 = vld [vmem:[%s2628_s11 + $0xe4] sm:$0xf]  ;;  %v1877_v31 = vld [vmem:[%s2628_s11 + $0x15c] sm:$0xf]  ;;  %1151 = vmatpush.bf16.msra.mxu1 %v1762_v30 }
 0x109   :  { %v521_v33 = vadd.f32 %v520_v13, %v508_v32  ;;  %v1872_v13 = vld [vmem:[%s2628_s11 + $0x130] sm:$0xf0] }
 0x10b   :  { %v534_v35 = vadd.f32 %v533_v9, %v521_v33  ;;  %v1880_v9 = vld [vmem:[%s2628_s11 + $0x170] sm:$0xf0]  ;;  %v1637_v33 = vld [vmem:[%s2628_s11 + $0xa8] sm:$0xf] }
 0x10d   :  { %v547_v36 = vadd.f32 %v546_v18, %v534_v35  ;;  %v1694_v18 = vor.u32 %v1872_v13, %v1693_v12  ;;  %v1731_v35 = vld [vmem:[%s2628_s11 + $0x174] sm:$0xf0]  ;;  %v1590_v12 = vor.u32 %v1845_v5, %v1589_v4  ;;  %v1834_v13 = vld [vmem:[%s2628_s11 + $0x4] sm:$0xf]  ;;  %v1868_v4 = vld [vmem:[%s2628_s11 + $0x110] sm:$0xf0] }
 0x10e   :  { %v509_v34 = vpop.f32.mrf.mxu1 }
 0x10f   :  { %1114 = vmatpush.bf16.msra.mxu2 %v1694_v18  ;;  %v1858_v34 = vld [vmem:[%s2628_s11 + $0xc0] sm:$0xf0]  ;;  %v1561_v18 = vld [vmem:[%s2628_s11 + $0x8] sm:$0xf] }
 0x116   :  { %v559_v37 = vpop.f32.mrf.mxu1 }
 0x117   :  { %v560_v38 = vadd.f32 %v559_v37, %v547_v36  ;;  %v1670_v36 = vor.u32 %v1862_v23, %v1667_v26  ;;  %v1674_v37 = vor.u32 %v1866_v29, %v1673_v28  ;;  %v1885_v23 = vld [vmem:[%s2628_s11 + $0x19c] sm:$0xf]  ;;  %v1773_v26 = vld [vmem:[%s2628_s11 + $0x1a0] sm:$0xf]  ;;  %v1622_v29 = vor.u32 %v1849_v14, %v1619_v15 }
 0x118   :  { %v1889_v28 = vld [vmem:[%s2628_s11 + $0x1b8] sm:$0xf0]  ;;  %v1625_v15 = vld [vmem:[%s2628_s11 + $0x80] sm:$0xf] }
 0x119   :  { %v573_v39 = vadd.f32 %v572_v20, %v560_v38  ;;  %v1865_v20 = vld [vmem:[%s2628_s11 + $0xf8] sm:$0xf0]  ;;  %v1855_v38 = vld [vmem:[%s2628_s11 + $0xac] sm:$0xf]  ;;  %1128 = vmatpush.bf16.msrb.mxu3 %v1670_v36  ;;  %v1774_v36 = vor.u32 %v1889_v28, %v1773_v26  ;;  %v1599_v28 = vld [vmem:[%s2628_s11 + $0x64] sm:$0xf0] }
 0x11a   :  { %v1666_v32 = vor.u32 %v1865_v20, %v1665_v19  ;;  %v1838_v19 = vld [vmem:[%s2628_s11 + $0x20] sm:$0xf0]  ;;  %v1843_v26 = vld [vmem:[%s2628_s11 + $0x4c] sm:$0xf] }
 0x11b   :  { %v586_v41 = vadd.f32 %v585_v11, %v573_v39  ;;  %v1730_v11 = vor.u32 %v1880_v9, %v1729_v8  ;;  %v1639_v39 = vld [vmem:[%s2628_s11 + $0xc4] sm:$0xf0]  ;;  %v1553_v8 = vld [vmem:[%s2628_s11] sm:$0xf]  ;;  %v1837_v9 = vld [vmem:[%s2628_s11 + $0x18] sm:$0xf0] }
 0x11c   :  { %1115 = vmatpush.bf16.msra.mxu2 %v1666_v32  ;;  %v1642_v49 = vor.u32 %v1855_v38, %v1639_v39  ;;  %v1554_v24 = vor.u32 %v1837_v9, %v1553_v8  ;;  %v1562_v32 = vor.u32 %v1838_v19, %v1561_v18  ;;  %v1881_v38 = vld [vmem:[%s2628_s11 + $0x178] sm:$0xf0]  ;;  %v1739_v39 = vld [vmem:[%s2628_s11 + $0x17c] sm:$0xf0] }
 0x11d   :  { %v593_v42 = vadd.f32 %v1897_v40, %v586_v41  ;;  %1139 = vmatpush.bf16.msra.mxu0 %v1730_v11  ;;  %v1645_v40 = vld [vmem:[%s2628_s11 + $0xb0] sm:$0xf]  ;;  %v1734_v41 = vor.u32 %v1877_v31, %v1731_v35  ;;  %v1586_v11 = vor.u32 %v1841_v0, %v1583_v3  ;;  %v1558_v31 = vor.u32 %v1834_v13, %v1555_v17  ;;  %v1689_v3 = vld [vmem:[%s2628_s11 + $0xf8] sm:$0xf]  ;;  %v1857_v8 = vld [vmem:[%s2628_s11 + $0xbc] sm:$0xf] }
 0x11e   :  { %v561_v43 = vpop.f32.mrf.mxu1  ;;  %1129 = vmatpush.bf16.msrb.mxu3 %v1642_v49  ;;  %v1770_v35 = vor.u32 %v1885_v23, %v1767_v25  ;;  %v1874_v49 = vld [vmem:[%s2628_s11 + $0x140] sm:$0xf0]  ;;  %v1683_v0 = vld [vmem:[%s2628_s11 + $0x10c] sm:$0xf0]  ;;  %v1690_v5 = vor.u32 %v1868_v4, %v1689_v3  ;;  %v1627_v19 = vld [vmem:[%s2628_s11 + $0x9c] sm:$0xf0] }
 0x11f   :  { %v594_v44 = vmax.f32 %v593_v42, 0.0  ;;  %v1859_v42 = vld [vmem:[%s2628_s11 + $0xc8] sm:$0xf0]  ;;  %v1870_v43 = vld [vmem:[%s2628_s11 + $0x124] sm:$0xf]  ;;  %1152 = vmatpush.bf16.msra.mxu1 %v1734_v41 }
 0x120   :  { %v1646_v50 = vor.u32 %v1859_v42, %v1645_v40  ;;  %v1745_v40 = vld [vmem:[%s2628_s11 + $0x168] sm:$0xf]  ;;  %v1882_v41 = vld [vmem:[%s2628_s11 + $0x180] sm:$0xf0] }
 0x121   :  { %v595_v45 = vpack.c.bf16 %v594_v44, %v594_v44  ;;  %1140 = vmatpush.bf16.msra.mxu0 %v1702_v22  ;;  %v1703_v44 = vld [vmem:[%s2628_s11 + $0x13c] sm:$0xf0]  ;;  %v1888_v22 = vld [vmem:[%s2628_s11 + $0x1b0] sm:$0xf0]  ;;  %v1850_v17 = vld [vmem:[%s2628_s11 + $0x84] sm:$0xf] }
 0x122   :  { %v1706_v48 = vor.u32 %v1870_v43, %v1703_v44  ;;  %v1746_v44 = vor.u32 %v1882_v41, %v1745_v40  ;;  %v1846_v25 = vld [vmem:[%s2628_s11 + $0x60] sm:$0xf0] }
 0x123   :  { %672 = vmatmul.bf16.vlgmr.msrb.gmra.mxu0 %v595_v45  ;;  %v1638_v45 = vor.u32 %v1858_v34, %v1637_v33  ;;  %v1766_v33 = vor.u32 %v1888_v22, %v1765_v21  ;;  %v1854_v21 = vld [vmem:[%s2628_s11 + $0xa0] sm:$0xf0]  ;;  %v1630_v22 = vor.u32 %v1850_v17, %v1627_v19 }
 0x124   :  { %1153 = vmatpush.bf16.msra.mxu1 %v1706_v48 }
 0x125   :  { %1141 = vmatpush.bf16.msra.mxu0 %v1674_v37  ;;  %1116 = vmatpush.bf16.msra.mxu2 %v1638_v45  ;;  %v1737_v37 = vld [vmem:[%s2628_s11 + $0x160] sm:$0xf]  ;;  %v1842_v45 = vld [vmem:[%s2628_s11 + $0x44] sm:$0xf] }
 0x126   :  { %v1738_v42 = vor.u32 %v1881_v38, %v1737_v37  ;;  %v1594_v48 = vor.u32 %v1842_v45, %v1591_v46  ;;  %v1571_v37 = vld [vmem:[%s2628_s11 + $0x2c] sm:$0xf0]  ;;  %v1577_v38 = vld [vmem:[%s2628_s11 + $0x18] sm:$0xf] }
 0x129   :  { %1142 = vmatpush.bf16.msra.mxu0 %v1646_v50  ;;  %1117 = vmatpush.bf16.msra.mxu2 %v1610_v58  ;;  %v1871_v50 = vld [vmem:[%s2628_s11 + $0x12c] sm:$0xf] }
 0x12a   :  { %v1835_v58 = vld [vmem:[%s2628_s11 + $0xc] sm:$0xf] }
 0x12d   :  { %1118 = vmatpush.bf16.msra.mxu2 %v1582_v7  ;;  %v1860_v7 = vld [vmem:[%s2628_s11 + $0xd0] sm:$0xf0] }
 0x131   :  { %1119 = vmatpush.bf16.msra.mxu2 %v1554_v24  ;;  %v1597_v24 = vld [vmem:[%s2628_s11 + $0x48] sm:$0xf] }
 0x135   :  { %1164 = vmatpush.bf16.msrb.mxu2 %v1766_v33 }
 0x139   :  { %1165 = vmatpush.bf16.msrb.mxu2 %v1738_v42  ;;  %v1899_v42 = vld [vmem:[%s2627_s10] ss:$0 sm:$0xff]  ;;  %s1296_s10 = sshll.u32 %s2631_s14, 4  ;;  %s1297_s10 = int_to_ptr.hbm [resolvable:$true] %s1296_s10 }
 0x1a0   :  { %v673_v52 = vpop.f32.mrf.mxu0 }
 0x1a1   :  { %v2253_v53 = vadd.f32 %v1898_v51, %v673_v52  ;;  %v1848_v51 = vld [vmem:[%s2628_s11 + $0x74] sm:$0xf]  ;;  %v1863_v52 = vld [vmem:[%s2628_s11 + $0xec] sm:$0xf] }
 0x1a3   :  { %v679_v54 = vmul.f32 0.5, %v2253_v53  ;;  %677 = vst [vmem:[#allocation4] sm:$0x3] %v2253_v53 }
 0x1a5   :  { %v680_v55 = vmul.f32 1.442695, %v679_v54  ;;  %v1675_v54 = vld [vmem:[%s2628_s11 + $0x104] sm:$0xf0] }
 0x1a6   :  { %v1678_v61 = vor.u32 %v1863_v52, %v1675_v54  ;;  %v1710_v52 = vor.u32 %v1874_v49, %v1709_v47 }
 0x1a7   :  { %1900 = vpow2.f32 %v680_v55  ;;  %v1611_v55 = vld [vmem:[%s2628_s11 + $0x8c] sm:$0xf0] }
 0x1a8   :  { %v675_v56 = vpop.f32.mrf.mxu0  ;;  %v1614_v62 = vor.u32 %v1848_v51, %v1611_v55  ;;  %1154 = vmatpush.bf16.msra.mxu1 %v1678_v61  ;;  %v1711_v51 = vld [vmem:[%s2628_s11 + $0x144] sm:$0xf0]  ;;  %v1717_v55 = vld [vmem:[%s2628_s11 + $0x130] sm:$0xf]  ;;  %1166 = vmatpush.bf16.msrb.mxu2 %v1710_v52  ;;  %v1566_v61 = vor.u32 %v1835_v58, %v1563_v59 }
 0x1a9   :  { %v1617_v56 = vld [vmem:[%s2628_s11 + $0x78] sm:$0xf]  ;;  %v1714_v54 = vor.u32 %v1871_v50, %v1711_v51 }
 0x1aa   :  { %1130 = vmatpush.bf16.msrb.mxu3 %v1614_v62  ;;  %v1867_v62 = vld [vmem:[%s2628_s11 + $0x108] sm:$0xf0] }
 0x1ab   :  { %v1682_v1 = vor.u32 %v1867_v62, %v1681_v60 }
 0x1ac   :  { %1155 = vmatpush.bf16.msra.mxu1 %v1650_v10  ;;  %v1655_v10 = vld [vmem:[%s2628_s11 + $0xd4] sm:$0xf0] }
 0x1ad   :  { %v1901_v57 = vpop.eup %1900  ;;  %1167 = vmatpush.bf16.msrb.mxu2 %v1682_v1  ;;  %v1658_v13 = vor.u32 %v1857_v8, %v1655_v10 }
 0x1ae   :  { %683 = vrot.lane.b32.xlu0 %v1901_v57, %s1971_s8  ;;  %v1852_v57 = vld [vmem:[%s2628_s11 + $0x90] sm:$0xf0]  ;;  %1131 = vmatpush.bf16.msrb.mxu3 %v1586_v11  ;;  %v1661_v11 = vld [vmem:[%s2628_s11 + $0xc0] sm:$0xf] }
 0x1af   :  { %v1618_v63 = vor.u32 %v1852_v57, %v1617_v56  ;;  %v1875_v56 = vld [vmem:[%s2628_s11 + $0x148] sm:$0xf0] }
 0x1b0   :  { %1156 = vmatpush.bf16.msra.mxu1 %v1622_v29  ;;  %v1718_v57 = vor.u32 %v1875_v56, %v1717_v55  ;;  %v1605_v29 = vld [vmem:[%s2628_s11 + $0x50] sm:$0xf] }
 0x1b1   :  { %1143 = vmatpush.bf16.msra.mxu0 %v1618_v63  ;;  %v1864_v63 = vld [vmem:[%s2628_s11 + $0xf4] sm:$0xf] }
 0x1b2   :  { %1132 = vmatpush.bf16.msrb.mxu3 %v1558_v31  ;;  %v1686_v2 = vor.u32 %v1864_v63, %v1683_v0  ;;  %v1598_v31 = vor.u32 %v1846_v25, %v1597_v24 }
 0x1b4   :  { %1157 = vmatpush.bf16.msra.mxu1 %v1594_v48 }
 0x1b5   :  { %1144 = vmatpush.bf16.msra.mxu0 %v1590_v12  ;;  %v1861_v12 = vld [vmem:[%s2628_s11 + $0xd8] sm:$0xf0] }
 0x1b6   :  { %1177 = vmatpush.bf16.msra.mxu3 %v1770_v35  ;;  %v1662_v14 = vor.u32 %v1861_v12, %v1661_v11  ;;  %v1839_v35 = vld [vmem:[%s2628_s11 + $0x28] sm:$0xf0] }
 0x1b8   :  { %1158 = vmatpush.bf16.msra.mxu1 %v1566_v61 }
 0x1b9   :  { %1145 = vmatpush.bf16.msra.mxu0 %v1562_v32  ;;  %v1602_v32 = vor.u32 %v1843_v26, %v1599_v28 }
 0x1bd   :  { %1190 = vmatpush.bf16.msrb.mxu0 %v1774_v36  ;;  %v1836_v36 = vld [vmem:[%s2628_s11 + $0x14] sm:$0xf] }
 0x1be   :  { %v1574_v40 = vor.u32 %v1836_v36, %v1571_v37 }
 0x1c1   :  { %1191 = vmatpush.bf16.msrb.mxu0 %v1746_v44 }
 0x1c5   :  { %1192 = vmatpush.bf16.msrb.mxu0 %v1718_v57 }
 0x1c9   :  { %1193 = vmatpush.bf16.msrb.mxu0 %v1690_v5 }
 0x1cd   :  { %1194 = vmatpush.bf16.msrb.mxu0 %v1662_v14 }
 0x220   :  { %v684_v16 = vpop.permute.xlu0 %683 }
 0x221   :  { %v686_v20 = vmul.f32 %v684_v16, %v678_v6  ;;  %v1653_v6 = vld [vmem:[%s2628_s11 + $0xb8] sm:$0xf]  ;;  %v1853_v16 = vld [vmem:[%s2628_s11 + $0x98] sm:$0xf0] }
 0x222   :  { %v1654_v9 = vor.u32 %v1860_v7, %v1653_v6  ;;  %v1626_v18 = vor.u32 %v1853_v16, %v1625_v15 }
 0x223   :  { %v687_v30 = vadd.f32 %v686_v20, %v2253_v53  ;;  %v1878_v53 = vld [vmem:[%s2628_s11 + $0x164] sm:$0xf]  ;;  %v1633_v20 = vld [vmem:[%s2628_s11 + $0x88] sm:$0xf] }
 0x224   :  { %v1742_v43 = vor.u32 %v1878_v53, %v1739_v39  ;;  %1168 = vmatpush.bf16.msrb.mxu2 %v1654_v9  ;;  %v1634_v23 = vor.u32 %v1854_v21, %v1633_v20  ;;  %v1840_v53 = vld [vmem:[%s2628_s11 + $0x30] sm:$0xf0] }
 0x225   :  { %v688_v34 = vpack.c.bf16 %v687_v30, %v687_v30  ;;  %v1847_v30 = vld [vmem:[%s2628_s11 + $0x68] sm:$0xf0]  ;;  %v1578_v41 = vor.u32 %v1840_v53, %v1577_v38 }
 0x226   :  { %1178 = vmatpush.bf16.msra.mxu3 %v1742_v43  ;;  %1195 = vmatpush.bf16.msrb.mxu0 %v1634_v23  ;;  %v1606_v33 = vor.u32 %v1847_v30, %v1605_v29 }
 0x227   :  { %1550 = vmatmul.msk.bf16.vlgmr.msrb.gmra.mxu1 %vm713_vm6, %v688_v34  ;;  %v1569_v34 = vld [vmem:[%s2628_s11 + $0x10] sm:$0xf]  ;;  %s1972_s11 = smov [#allocation4]   ;;  %vm1264_vm6 = vcmask 1043456  }
 0x228   :  { %1169 = vmatpush.bf16.msrb.mxu2 %v1626_v18  ;;  %v1570_v39 = vor.u32 %v1839_v35, %v1569_v34  ;;  %s1294_s1 = sshll.u32 %s1972_s11, 4  ;;  %s1295_s1 = int_to_ptr.vmem [resolvable:$true] %s1294_s1 }
 0x229   :  { %1299 = dma.vmem_to_hbm [thread:$0]  %s1295_s1, 32, %s1297_s10, [#allocation5]  }
 0x22a   :  { %1179 = vmatpush.bf16.msra.mxu3 %v1714_v54  ;;  %1196 = vmatpush.bf16.msrb.mxu0 %v1606_v33 }
 0x22c   :  { %1170 = vmatpush.bf16.msrb.mxu2 %v1598_v31 }
 0x22e   :  { %1180 = vmatpush.bf16.msra.mxu3 %v1686_v2  ;;  %1197 = vmatpush.bf16.msrb.mxu0 %v1578_v41 }
 0x230   :  { %1171 = vmatpush.bf16.msrb.mxu2 %v1570_v39 }
 0x232   :  { %1181 = vmatpush.bf16.msra.mxu3 %v1658_v13 }
 0x236   :  { %1182 = vmatpush.bf16.msra.mxu3 %v1630_v22 }
 0x23a   :  { %1183 = vmatpush.bf16.msra.mxu3 %v1602_v32 }
 0x23e   :  { %1184 = vmatpush.bf16.msra.mxu3 %v1574_v40 }
 0x2a4   :  { %v733_v43 = vpop.f32.mrf.mxu1 }
 0x2a5   :  { %v734_v44 = vadd.f32 %v733_v43, %v2237_v27  ;;  %v808_v27 = vld [vmem:[%s2629_s12] sm:$0x7f]  ;;  %s1973_s12 = smov [#allocation2]  }
 0x2a6   :  { %v812_v51 = vperm.slane %v808_v27, 2  ;;  %v810_v52 = vperm.slane %v808_v27, 0  ;;  %v811_v54 = vperm.slane %v808_v27, 1  ;;  %v813_v55 = vperm.slane %v808_v27, 3  ;;  %s1283_s14 = sshll.u32 %s1973_s12, 4  ;;  %s1284_s14 = int_to_ptr.vmem [resolvable:$true] %s1283_s14 }
 0x2a7   :  { %v741_v45 = vadd.f32 %v1899_v42, %v734_v44  ;;  %v816_v6 = vperm.slane %v808_v27, 6  ;;  %v814_v9 = vperm.slane %v808_v27, 4  ;;  %v815_v10 = vperm.slane %v808_v27, 5 }
 0x2a9   :  { %v742_v46 = vmax.f32 %v741_v45, 0.0 }
 0x2ab   :  { %v743_v47 = vpack.c.bf16 %v742_v46, %v742_v46 }
 0x2ac   :  { %v735_v48 = vpop.f32.mrf.mxu1 }
 0x2ad   :  { %1120 = vmatmul.bf16.vlgmr.msra.gmra.mxu2 %v743_v47  ;;  %1133 = vmatmul.bf16.vlgmr.msrb.gmra.mxu3 %v743_v47 }
 0x2ae   :  { %1146 = vmatmul.bf16.vlgmr.msra.gmra.mxu0 %v743_v47  ;;  %1159 = vmatmul.bf16.vlgmr.msra.gmra.mxu1 %v743_v47 }
 0x2bd   :  { %1172 = vmatmul.bf16.vlgmr.msrb.gmra.mxu2 %v743_v47  ;;  %1185 = vmatmul.bf16.vlgmr.msra.gmra.mxu3 %v743_v47 }
 0x2be   :  { %1198 = vmatmul.bf16.vlgmr.msrb.gmra.mxu0 %v743_v47 }
 0x32b   :  { %v1147_v49 = vpop.f32.mrf.mxu0  ;;  %v1160_v50 = vpop.f32.mrf.mxu1 }
 0x32c   :  { %v1148_v56 = vadd.f32 %v1147_v49, %v812_v51  ;;  %v1161_v61 = vadd.f32 %v1160_v50, %v813_v55 }
 0x32e   :  { %v1205_v0 = vmul.f32 0.5, %v1148_v56  ;;  %v1206_v3 = vmul.f32 0.5, %v1161_v61 }
 0x330   :  { %v1121_v57 = vpop.f32.mrf.mxu2  ;;  %v1134_v58 = vpop.f32.mrf.mxu3  ;;  %1902 = vtanh.f32 %v1205_v0 }
 0x331   :  { %v1122_v59 = vadd.f32 %v1121_v57, %v810_v52  ;;  %v1135_v60 = vadd.f32 %v1134_v58, %v811_v54 }
 0x333   :  { %v1149_v62 = vpop.f32.mrf.mxu0  ;;  %v1162_v63 = vpop.f32.mrf.mxu1  ;;  %v1203_v1 = vmul.f32 0.5, %v1122_v59  ;;  %v1204_v2 = vmul.f32 0.5, %v1135_v60 }
 0x335   :  { %1904 = vtanh.f32 %v1203_v1 }
 0x336   :  { %1906 = vtanh.f32 %v1204_v2  ;;  %v1903_v11 = vpop.eup %1902 }
 0x337   :  { %1908 = vtanh.f32 %v1206_v3  ;;  %v1219_v25 = vadd.f32 1.0, %v1903_v11 }
 0x338   :  { %v1123_v4 = vpop.f32.mrf.mxu2  ;;  %v1136_v5 = vpop.f32.mrf.mxu3 }
 0x339   :  { %v1226_v32 = vmul.f32 0.5, %v1219_v25 }
 0x33b   :  { %v1199_v7 = vpop.f32.mrf.mxu0  ;;  %v1905_v13 = vpop.eup %1904 }
 0x33c   :  { %v1200_v8 = vadd.f32 %v1199_v7, %v816_v6  ;;  %v1907_v14 = vpop.eup %1906  ;;  %v1217_v20 = vadd.f32 1.0, %v1905_v13 }
 0x33d   :  { %v1909_v17 = vpop.eup %1908  ;;  %v1218_v21 = vadd.f32 1.0, %v1907_v14 }
 0x33e   :  { %v1209_v12 = vmul.f32 0.5, %v1200_v8  ;;  %v1220_v26 = vadd.f32 1.0, %v1909_v17  ;;  %v1224_v29 = vmul.f32 0.5, %v1217_v20 }
 0x33f   :  { %v1225_v30 = vmul.f32 0.5, %v1218_v21 }
 0x340   :  { %1910 = vtanh.f32 %v1209_v12  ;;  %v1173_v15 = vpop.f32.mrf.mxu2  ;;  %v1186_v16 = vpop.f32.mrf.mxu3  ;;  %v1227_v33 = vmul.f32 0.5, %v1220_v26 }
 0x341   :  { %v1174_v18 = vadd.f32 %v1173_v15, %v814_v9  ;;  %v1187_v19 = vadd.f32 %v1186_v16, %v815_v10  ;;  %v1231_v38 = vpack.c.bf16 %v1225_v30, %v1224_v29 }
 0x342   :  { %v1232_v39 = vpack.c.bf16 %v1227_v33, %v1226_v32 }
 0x343   :  { %v1207_v22 = vmul.f32 0.5, %v1174_v18  ;;  %v1208_v23 = vmul.f32 0.5, %v1187_v19  ;;  %v1201_v24 = vpop.f32.mrf.mxu0  ;;  %v1239_v44 = vrot.slane %v1231_v38, 3 }
 0x344   :  { %v1240_v46 = vrot.slane %v1232_v39, 6  ;;  %v1241_v47 = vrot.slane %v1232_v39, 1 }
 0x345   :  { %1912 = vtanh.f32 %v1207_v22  ;;  %v1248_v52 = vsel %vm717_vm4, %v1231_v38, %v1239_v44 }
 0x346   :  { %v1911_v28 = vpop.eup %1910  ;;  %1914 = vtanh.f32 %v1208_v23  ;;  %v1252_v54 = vsel %vm1249_vm9, %v1240_v46, %v1241_v47 }
 0x347   :  { %v1223_v31 = vadd.f32 1.0, %v1911_v28  ;;  %v1253_v57 = vsel %vm718_vm5, %v1248_v52, %v1252_v54 }
 0x348   :  { %v1175_v34 = vpop.f32.mrf.mxu2  ;;  %v1188_v35 = vpop.f32.mrf.mxu3 }
 0x349   :  { %v1230_v36 = vmul.f32 0.5, %v1223_v31 }
 0x34b   :  { %v1913_v37 = vpop.eup %1912  ;;  %v1234_v41 = vpack.c.bf16 %v1230_v36, %v1230_v36 }
 0x34c   :  { %v1915_v53 = vpop.eup %1914  ;;  %v1221_v40 = vadd.f32 1.0, %v1913_v37 }
 0x34d   :  { %v1222_v42 = vadd.f32 1.0, %v1915_v53  ;;  %v1244_v48 = vrot.slane %v1234_v41, 2  ;;  %v1245_v27 = vrot.slane %v1234_v41, 5 }
 0x34e   :  { %v1228_v43 = vmul.f32 0.5, %v1221_v40 }
 0x34f   :  { %v1229_v45 = vmul.f32 0.5, %v1222_v42  ;;  %v1261_v56 = vsel %vm1258_vm0, %v1244_v48, %v1245_v27 }
 0x351   :  { %v1233_v49 = vpack.c.bf16 %v1229_v45, %v1228_v43 }
 0x353   :  { %v1242_v50 = vrot.slane %v1233_v49, 4  ;;  %v1243_v51 = vrot.slane %v1233_v49, 7 }
 0x355   :  { %v1257_v55 = vsel %vm1254_vm12, %v1242_v50, %v1243_v51 }
 0x356   :  { %v1263_v58 = vsel %vm1262_vm3, %v1257_v55, %v1261_v56 }
 0x357   :  { %v1265_v59 = vsel %vm1264_vm6, %v1253_v57, %v1263_v58 }
 0x358   :  { %1277 = vst.msk [vmem:[#allocation2] sm:$0x7f] %vm1276_vm7, %v1265_v59 }
 0x359   :  { %1288 = dma.vmem_to_hbm [thread:$0]  %s1284_s14, 112, %s1286_s27, [#allocation3]  }
 0x35a   :  { %1964 = dma.done.wait [#allocation3], 112  }
 0x35b   :  { %1965 = vsyncadd [#allocation3], 4294967184 }
 0x35c   :  { %1966 = dma.done.wait [#allocation5], 32  }
 0x35d   :  { %1967 = vsyncadd [#allocation5], 4294967264 }
 0x35e   :  { %1308 = vsyncpa [#allocation3], 1 }
 0x35f   :  { %1309 = vsyncpa [#allocation5], 1 }

</bundles_post_ra>
